<compile_context>
chip_gen: v5e
topology: v5e:2x2
jax: 0.10.0
libtpu: 0.0.40
codegen_flags: <defaults>
</compile_context>

<pallas_src>
import functools

import jax
import jax.numpy as jnp
from jax.experimental import pallas as pl
from jax.experimental.pallas import tpu as pltpu


def _round_up(x, m):
    return ((x + m - 1) // m) * m


HEAD_WIDTH = 128  # lane-dense fused head output width


# ----------------------------- Pallas kernel --------------------------------
def _critic_kernel(x_ref,                          # (TB, Din)  = obs|feat
                   w0_ref, b0_ref,                 # fc0[0]: (Din,128),(1,128)
                   w1_ref, b1_ref,                 # fc0[2]: (128,256),(1,256)
                   w2_ref, b2_ref,                 # fc1:    (256,256),(1,256)
                   w3_ref, b3_ref,                 # fc2:    (256,Hp),(1,Hp)
                   wh_ref, bh_ref,                 # fused head: (Hp,128),(1,128)
                   out_ref,                        # (TB, 128)
                   *, num_actions):
    f32 = jnp.float32
    cdt = w1_ref.dtype   # matmul-input dtype (bf16 or f32); accumulate in f32

    x = x_ref[...].astype(cdt)

    # fc0: Linear -> ReLU -> Linear -> ReLU
    h = jnp.dot(x, w0_ref[...], preferred_element_type=f32) + b0_ref[...]
    h = jnp.maximum(h, 0.0)
    h = jnp.dot(h.astype(cdt), w1_ref[...], preferred_element_type=f32) + b1_ref[...]
    h = jnp.maximum(h, 0.0)

    # fc1: Linear -> ReLU
    h = jnp.dot(h.astype(cdt), w2_ref[...], preferred_element_type=f32) + b2_ref[...]
    h = jnp.maximum(h, 0.0)

    # fc2: Linear -> ReLU   (output zero-padded to Hp = 128 lanes)
    h = jnp.dot(h.astype(cdt), w3_ref[...], preferred_element_type=f32) + b3_ref[...]
    h = jnp.maximum(h, 0.0)

    # fused head, lane-dense 128 columns:
    #   col 0            = value
    #   cols 1..A        = advantage
    #   col A+1          = mean(advantage)   (folded into the matmul)
    #   cols A+2..127    = zeros (padding)
    hd = jnp.dot(h.astype(cdt), wh_ref[...], preferred_element_type=f32) + bh_ref[...]
    value = hd[:, 0:1]
    adv_mean = hd[:, num_actions + 1:num_actions + 2]

    # columns 1..A of (hd + value - adv_mean) == value + adv - mean(adv);
    # the other columns are garbage and are sliced off in the wrapper.
    out_ref[...] = (hd + (value - adv_mean)).astype(out_ref.dtype)


# ------------------------------- wrapper -------------------------------------
def critic_forward(obs, feat, params, *, block_rows=512,
                   compute_dtype=jnp.float32):
    """obs: [B, ...], feat: [B, ...]  ->  q_values: [B, num_actions]."""
    B = obs.shape[0]
    obs = obs.reshape(B, -1)
    feat = feat.reshape(B, -1)
    x = jnp.concatenate([obs, feat], axis=-1)          # single K=Din fc0 matmul
    d_in = x.shape[1]

    (w0, b0, w1, b1, w2, b2, w3, b3, wv, bv, wa, ba) = params
    num_actions = wa.shape[1]
    assert num_actions + 2 <= HEAD_WIDTH
    hid3 = w3.shape[1]                                  # obs_space[0]*2
    hid3_pad = _round_up(hid3, 128)                     # lane-dense fc2 activation

    cdt = jnp.dtype(compute_dtype)
    f32 = jnp.float32

    # fc2 padded to hid3_pad output columns (zero weight/bias cols -> ReLU(0)=0)
    w3p = jnp.zeros((w3.shape[0], hid3_pad), f32).at[:, :hid3].set(w3)
    b3p = jnp.zeros((1, hid3_pad), f32).at[:, :hid3].set(b3)

    # fused head (hid3_pad, 128): value | adv | mean(adv) | zeros
    wh = jnp.zeros((hid3_pad, HEAD_WIDTH), f32)
    wh = wh.at[:hid3, 0:1].set(wv)
    wh = wh.at[:hid3, 1:1 + num_actions].set(wa)
    wh = wh.at[:hid3, 1 + num_actions:2 + num_actions].set(
        jnp.sum(wa, axis=1, keepdims=True) / num_actions)
    bh = jnp.zeros((1, HEAD_WIDTH), f32)
    bh = bh.at[:, 0:1].set(bv)
    bh = bh.at[:, 1:1 + num_actions].set(ba)
    bh = bh.at[:, 1 + num_actions:2 + num_actions].set(
        jnp.mean(ba, axis=1, keepdims=True))

    weights = (w0.astype(cdt), b0.astype(f32),
               w1.astype(cdt), b1.astype(f32),
               w2.astype(cdt), b2.astype(f32),
               w3p.astype(cdt), b3p.astype(f32),
               wh.astype(cdt), bh.astype(f32))

    # batch tiling: 16-aligned for bf16 (sublane packing), 8-aligned for f32;
    # for B >= 16 force >= 2 grid steps so v7x can shard the "parallel" axis
    # across both TensorCores.
    align = 16 if cdt == jnp.bfloat16 else 8
    b_al = _round_up(B, align)
    if B >= 16:
        tb = _round_up(-(-b_al // 2), align)
    else:
        tb = b_al
    tb = max(align, min(_round_up(block_rows, align), tb))
    b_pad = _round_up(B, tb)
    if b_pad != B:
        x = jnp.pad(x, ((0, b_pad - B), (0, 0)))
    x = x.astype(cdt)

    grid = (b_pad // tb,)

    def resident_spec(arr):
        return pl.BlockSpec(arr.shape, lambda i: (0, 0))

    in_specs = ([pl.BlockSpec((tb, d_in), lambda i: (i, 0))]
                + [resident_spec(w) for w in weights])
    out_specs = pl.BlockSpec((tb, HEAD_WIDTH), lambda i: (i, 0))

    # advisory cost estimate for the XLA scheduler
    flops = 2 * b_pad * (d_in * 128 + 128 * 256 + 256 * 256
                         + 256 * hid3_pad + hid3_pad * HEAD_WIDTH)
    in_bytes = int(x.size) * x.dtype.itemsize + sum(
        int(a.size) * a.dtype.itemsize for a in weights)
    out_bytes = b_pad * HEAD_WIDTH * 4
    cost = pl.CostEstimate(flops=flops, transcendentals=0,
                           bytes_accessed=in_bytes + out_bytes)

    out = pl.pallas_call(
        functools.partial(_critic_kernel, num_actions=num_actions),
        out_shape=jax.ShapeDtypeStruct((b_pad, HEAD_WIDTH), jnp.float32),
        grid=grid,
        in_specs=in_specs,
        out_specs=out_specs,
        compiler_params=pltpu.CompilerParams(
            dimension_semantics=("parallel",),
            vmem_limit_bytes=32 * 1024 * 1024),
        cost_estimate=cost,
    )(x, *weights)

    # drop padded rows; keep only the advantage columns 1..A of the fused head
    return out[:B, 1:1 + num_actions]


# --------------------------- parameter construction --------------------------
def init_linear(key, fan_in, fan_out):
    """PyTorch-style uniform(-1/sqrt(fan_in), 1/sqrt(fan_in)); W stored [in,out]."""
    kw, kb = jax.random.split(key)
    bound = 1.0 / jnp.sqrt(float(fan_in))
    w = jax.random.uniform(kw, (fan_in, fan_out), jnp.float32, -bound, bound)
    b = jax.random.uniform(kb, (1, fan_out), jnp.float32, -bound, bound)
    return w, b


def make_params(key, d_in, obs0, num_actions):
    keys = jax.random.split(key, 6)
    w0, b0 = init_linear(keys[0], d_in, 128)               # fc0[0]
    w1, b1 = init_linear(keys[1], 128, 256)                # fc0[2]
    w2, b2 = init_linear(keys[2], 256, 256)                # fc1
    w3, b3 = init_linear(keys[3], 256, obs0 * 2)           # fc2
    wv, bv = init_linear(keys[4], obs0 * 2, 1)             # value
    wa, ba = init_linear(keys[5], obs0 * 2, num_actions)   # adv
    return (w0, b0, w1, b1, w2, b2, w3, b3, wv, bv, wa, ba)


# ------------------------------ pure-JAX reference ---------------------------
def critic_ref(obs, feat, params):
    (w0, b0, w1, b1, w2, b2, w3, b3, wv, bv, wa, ba) = params
    B = obs.shape[0]
    x = jnp.concatenate([obs.reshape(B, -1), feat.reshape(B, -1)], axis=-1)
    h = jnp.maximum(x @ w0 + b0, 0.0)
    h = jnp.maximum(h @ w1 + b1, 0.0)
    h3 = jnp.maximum(h @ w2 + b2, 0.0)
    h3 = jnp.maximum(h3 @ w3 + b3, 0.0)
    value = h3 @ wv + bv
    adv = h3 @ wa + ba
    return value + adv - jnp.mean(adv, axis=1, keepdims=True)


# ----------------------------------- main ------------------------------------
if __name__ == "__main__":
    # args.N = 6  ->  fc0 input dim = N*4 + 8 = 32
    # obs flattens to 16 per sample, feat to 16; obs_space[0]*2 = 32; A = 8
    obs_dim = 16
    feat_dim = 16
    d_in = obs_dim + feat_dim
    num_actions = 8

    key = jax.random.PRNGKey(0)
    k_obs, k_feat, k_par = jax.random.split(key, 3)
    params = make_params(k_par, d_in, obs_dim, num_actions)

    # small batch (single grid step)
    B = 2
    obs = jax.random.normal(k_obs, (B, obs_dim), jnp.float32)
    feat = jax.random.normal(k_feat, (B, feat_dim), jnp.float32)
    q_ref = critic_ref(obs, feat, params)

    q32 = jax.block_until_ready(
        critic_forward(obs, feat, params, compute_dtype=jnp.float32))
    assert q32.shape == (B, num_actions)
    assert jnp.allclose(q32, q_ref, atol=1e-4, rtol=1e-4), "fp32 mismatch vs reference"

    qbf = jax.block_until_ready(
        critic_forward(obs, feat, params, compute_dtype=jnp.bfloat16))
    assert qbf.shape == (B, num_actions)
    assert jnp.allclose(qbf, q_ref, atol=5e-2, rtol=5e-2), "bf16 mismatch vs reference"

    # larger batch: exercises row padding + the >=2-step (megacore-friendly) grid
    B2 = 20
    obs2 = jax.random.normal(jax.random.fold_in(k_obs, 1), (B2, obs_dim), jnp.float32)
    feat2 = jax.random.normal(jax.random.fold_in(k_feat, 1), (B2, feat_dim), jnp.float32)
    q_ref2 = critic_ref(obs2, feat2, params)
    q2 = jax.block_until_ready(
        critic_forward(obs2, feat2, params, compute_dtype=jnp.float32))
    assert q2.shape == (B2, num_actions)
    assert jnp.allclose(q2, q_ref2, atol=1e-4, rtol=1e-4), "fp32 (B=20) mismatch"

    print("KERNEL_OK")
</pallas_src>

<mosaic_0001>
module attributes {stable_mosaic.version = 11 : i64} {
  func.func @_critic_kernel(%arg0: i32, %arg1: memref<8x32xf32, #tpu.memory_space<vmem>>, %arg2: memref<32x128xf32, #tpu.memory_space<vmem>>, %arg3: memref<1x128xf32, #tpu.memory_space<vmem>>, %arg4: memref<128x256xf32, #tpu.memory_space<vmem>>, %arg5: memref<1x256xf32, #tpu.memory_space<vmem>>, %arg6: memref<256x256xf32, #tpu.memory_space<vmem>>, %arg7: memref<1x256xf32, #tpu.memory_space<vmem>>, %arg8: memref<256x128xf32, #tpu.memory_space<vmem>>, %arg9: memref<1x128xf32, #tpu.memory_space<vmem>>, %arg10: memref<128x128xf32, #tpu.memory_space<vmem>>, %arg11: memref<1x128xf32, #tpu.memory_space<vmem>>, %arg12: memref<8x128xf32, #tpu.memory_space<vmem>>) attributes {dimension_semantics = [#tpu.dimension_semantics<parallel>], iteration_bounds = array<i64: 1>, scalar_prefetch = 0 : i64, scratch_operands = 0 : i64, tpu.core_type = #tpu.core_type<tc>, window_params = [{transform_indices = @transform_0, window_bounds = array<i64: 8, 32>}, {pipeline_mode = #tpu.pipeline_mode<synchronous>, transform_indices = @transform_1, window_bounds = array<i64: 32, 128>}, {pipeline_mode = #tpu.pipeline_mode<synchronous>, transform_indices = @transform_2, window_bounds = array<i64: 1, 128>}, {pipeline_mode = #tpu.pipeline_mode<synchronous>, transform_indices = @transform_3, window_bounds = array<i64: 128, 256>}, {pipeline_mode = #tpu.pipeline_mode<synchronous>, transform_indices = @transform_4, window_bounds = array<i64: 1, 256>}, {pipeline_mode = #tpu.pipeline_mode<synchronous>, transform_indices = @transform_5, window_bounds = array<i64: 256, 256>}, {pipeline_mode = #tpu.pipeline_mode<synchronous>, transform_indices = @transform_6, window_bounds = array<i64: 1, 256>}, {pipeline_mode = #tpu.pipeline_mode<synchronous>, transform_indices = @transform_7, window_bounds = array<i64: 256, 128>}, {pipeline_mode = #tpu.pipeline_mode<synchronous>, transform_indices = @transform_8, window_bounds = array<i64: 1, 128>}, {pipeline_mode = #tpu.pipeline_mode<synchronous>, transform_indices = @transform_9, window_bounds = array<i64: 128, 128>}, {pipeline_mode = #tpu.pipeline_mode<synchronous>, transform_indices = @transform_10, window_bounds = array<i64: 1, 128>}, {transform_indices = @transform_11, window_bounds = array<i64: 8, 128>}]} {
    %c0 = arith.constant 0 : index
    %c0_0 = arith.constant 0 : index
    %0 = vector.load %arg1[%c0, %c0_0] : memref<8x32xf32, #tpu.memory_space<vmem>>, vector<8x32xf32>
    %c0_1 = arith.constant 0 : index
    %c0_2 = arith.constant 0 : index
    %1 = vector.load %arg2[%c0_1, %c0_2] : memref<32x128xf32, #tpu.memory_space<vmem>>, vector<32x128xf32>
    %cst = arith.constant dense<0.000000e+00> : vector<8x128xf32>
    %2 = tpu.matmul %0, %1, %cst {dimension_numbers = #tpu.dot_dimension_numbers<[1], [0], [0], [1], [0, 0, 1, 1], [], []>} : vector<8x32xf32>, vector<32x128xf32>, vector<8x128xf32> -> vector<8x128xf32>
    %c0_3 = arith.constant 0 : index
    %c0_4 = arith.constant 0 : index
    %3 = vector.load %arg3[%c0_3, %c0_4] : memref<1x128xf32, #tpu.memory_space<vmem>>, vector<1x128xf32>
    %4 = vector.broadcast %3 : vector<1x128xf32> to vector<8x128xf32>
    %5 = arith.addf %2, %4 : vector<8x128xf32>
    %cst_5 = arith.constant 0.000000e+00 : f32
    %6 = vector.broadcast %cst_5 : f32 to vector<8x128xf32>
    %7 = arith.maximumf %5, %6 : vector<8x128xf32>
    %c0_6 = arith.constant 0 : index
    %c0_7 = arith.constant 0 : index
    %8 = vector.load %arg4[%c0_6, %c0_7] : memref<128x256xf32, #tpu.memory_space<vmem>>, vector<128x256xf32>
    %cst_8 = arith.constant dense<0.000000e+00> : vector<8x256xf32>
    %9 = tpu.matmul %7, %8, %cst_8 {dimension_numbers = #tpu.dot_dimension_numbers<[1], [0], [0], [1], [0, 0, 1, 1], [], []>} : vector<8x128xf32>, vector<128x256xf32>, vector<8x256xf32> -> vector<8x256xf32>
    %c0_9 = arith.constant 0 : index
    %c0_10 = arith.constant 0 : index
    %10 = vector.load %arg5[%c0_9, %c0_10] : memref<1x256xf32, #tpu.memory_space<vmem>>, vector<1x256xf32>
    %11 = vector.broadcast %10 : vector<1x256xf32> to vector<8x256xf32>
    %12 = arith.addf %9, %11 : vector<8x256xf32>
    %cst_11 = arith.constant 0.000000e+00 : f32
    %13 = vector.broadcast %cst_11 : f32 to vector<8x256xf32>
    %14 = arith.maximumf %12, %13 : vector<8x256xf32>
    %c0_12 = arith.constant 0 : index
    %c0_13 = arith.constant 0 : index
    %15 = vector.load %arg6[%c0_12, %c0_13] : memref<256x256xf32, #tpu.memory_space<vmem>>, vector<256x256xf32>
    %cst_14 = arith.constant dense<0.000000e+00> : vector<8x256xf32>
    %16 = tpu.matmul %14, %15, %cst_14 {dimension_numbers = #tpu.dot_dimension_numbers<[1], [0], [0], [1], [0, 0, 1, 1], [], []>} : vector<8x256xf32>, vector<256x256xf32>, vector<8x256xf32> -> vector<8x256xf32>
    %c0_15 = arith.constant 0 : index
    %c0_16 = arith.constant 0 : index
    %17 = vector.load %arg7[%c0_15, %c0_16] : memref<1x256xf32, #tpu.memory_space<vmem>>, vector<1x256xf32>
    %18 = vector.broadcast %17 : vector<1x256xf32> to vector<8x256xf32>
    %19 = arith.addf %16, %18 : vector<8x256xf32>
    %cst_17 = arith.constant 0.000000e+00 : f32
    %20 = vector.broadcast %cst_17 : f32 to vector<8x256xf32>
    %21 = arith.maximumf %19, %20 : vector<8x256xf32>
    %c0_18 = arith.constant 0 : index
    %c0_19 = arith.constant 0 : index
    %22 = vector.load %arg8[%c0_18, %c0_19] : memref<256x128xf32, #tpu.memory_space<vmem>>, vector<256x128xf32>
    %cst_20 = arith.constant dense<0.000000e+00> : vector<8x128xf32>
    %23 = tpu.matmul %21, %22, %cst_20 {dimension_numbers = #tpu.dot_dimension_numbers<[1], [0], [0], [1], [0, 0, 1, 1], [], []>} : vector<8x256xf32>, vector<256x128xf32>, vector<8x128xf32> -> vector<8x128xf32>
    %c0_21 = arith.constant 0 : index
    %c0_22 = arith.constant 0 : index
    %24 = vector.load %arg9[%c0_21, %c0_22] : memref<1x128xf32, #tpu.memory_space<vmem>>, vector<1x128xf32>
    %25 = vector.broadcast %24 : vector<1x128xf32> to vector<8x128xf32>
    %26 = arith.addf %23, %25 : vector<8x128xf32>
    %cst_23 = arith.constant 0.000000e+00 : f32
    %27 = vector.broadcast %cst_23 : f32 to vector<8x128xf32>
    %28 = arith.maximumf %26, %27 : vector<8x128xf32>
    %c0_24 = arith.constant 0 : index
    %c0_25 = arith.constant 0 : index
    %29 = vector.load %arg10[%c0_24, %c0_25] : memref<128x128xf32, #tpu.memory_space<vmem>>, vector<128x128xf32>
    %cst_26 = arith.constant dense<0.000000e+00> : vector<8x128xf32>
    %30 = tpu.matmul %28, %29, %cst_26 {dimension_numbers = #tpu.dot_dimension_numbers<[1], [0], [0], [1], [0, 0, 1, 1], [], []>} : vector<8x128xf32>, vector<128x128xf32>, vector<8x128xf32> -> vector<8x128xf32>
    %c0_27 = arith.constant 0 : index
    %c0_28 = arith.constant 0 : index
    %31 = vector.load %arg11[%c0_27, %c0_28] : memref<1x128xf32, #tpu.memory_space<vmem>>, vector<1x128xf32>
    %32 = vector.broadcast %31 : vector<1x128xf32> to vector<8x128xf32>
    %33 = arith.addf %30, %32 : vector<8x128xf32>
    %34 = vector.extract_strided_slice %33 {offsets = [0, 0], sizes = [8, 1], strides = [1, 1]} : vector<8x128xf32> to vector<8x1xf32>
    %35 = vector.extract_strided_slice %33 {offsets = [0, 9], sizes = [8, 1], strides = [1, 1]} : vector<8x128xf32> to vector<8x1xf32>
    %36 = arith.subf %34, %35 : vector<8x1xf32>
    %37 = vector.broadcast %36 : vector<8x1xf32> to vector<8x128xf32>
    %38 = arith.addf %33, %37 : vector<8x128xf32>
    %c0_29 = arith.constant 0 : index
    %c0_30 = arith.constant 0 : index
    %39 = vector.load %arg12[%c0_29, %c0_30] : memref<8x128xf32, #tpu.memory_space<vmem>>, vector<8x128xf32>
    tpu.vector_store %arg12[%c0_29, %c0_30], %38 {strides = array<i32>} : memref<8x128xf32, #tpu.memory_space<vmem>>, vector<8x128xf32>,
    return
  }
  func.func @transform_0(%arg0: i32) -> (i32, i32) {
    %c0_i32 = arith.constant 0 : i32
    %c0_i32_0 = arith.constant 0 : i32
    return %arg0, %c0_i32 : i32, i32
  }
  func.func @transform_1(%arg0: i32) -> (i32, i32) {
    %c0_i32 = arith.constant 0 : i32
    %c0_i32_0 = arith.constant 0 : i32
    %c0_i32_1 = arith.constant 0 : i32
    return %c0_i32, %c0_i32_0 : i32, i32
  }
  func.func @transform_2(%arg0: i32) -> (i32, i32) {
    %c0_i32 = arith.constant 0 : i32
    %c0_i32_0 = arith.constant 0 : i32
    %c0_i32_1 = arith.constant 0 : i32
    return %c0_i32, %c0_i32_0 : i32, i32
  }
  func.func @transform_3(%arg0: i32) -> (i32, i32) {
    %c0_i32 = arith.constant 0 : i32
    %c0_i32_0 = arith.constant 0 : i32
    %c0_i32_1 = arith.constant 0 : i32
    return %c0_i32, %c0_i32_0 : i32, i32
  }
  func.func @transform_4(%arg0: i32) -> (i32, i32) {
    %c0_i32 = arith.constant 0 : i32
    %c0_i32_0 = arith.constant 0 : i32
    %c0_i32_1 = arith.constant 0 : i32
    return %c0_i32, %c0_i32_0 : i32, i32
  }
  func.func @transform_5(%arg0: i32) -> (i32, i32) {
    %c0_i32 = arith.constant 0 : i32
    %c0_i32_0 = arith.constant 0 : i32
    %c0_i32_1 = arith.constant 0 : i32
    return %c0_i32, %c0_i32_0 : i32, i32
  }
  func.func @transform_6(%arg0: i32) -> (i32, i32) {
    %c0_i32 = arith.constant 0 : i32
    %c0_i32_0 = arith.constant 0 : i32
    %c0_i32_1 = arith.constant 0 : i32
    return %c0_i32, %c0_i32_0 : i32, i32
  }
  func.func @transform_7(%arg0: i32) -> (i32, i32) {
    %c0_i32 = arith.constant 0 : i32
    %c0_i32_0 = arith.constant 0 : i32
    %c0_i32_1 = arith.constant 0 : i32
    return %c0_i32, %c0_i32_0 : i32, i32
  }
  func.func @transform_8(%arg0: i32) -> (i32, i32) {
    %c0_i32 = arith.constant 0 : i32
    %c0_i32_0 = arith.constant 0 : i32
    %c0_i32_1 = arith.constant 0 : i32
    return %c0_i32, %c0_i32_0 : i32, i32
  }
  func.func @transform_9(%arg0: i32) -> (i32, i32) {
    %c0_i32 = arith.constant 0 : i32
    %c0_i32_0 = arith.constant 0 : i32
    %c0_i32_1 = arith.constant 0 : i32
    return %c0_i32, %c0_i32_0 : i32, i32
  }
  func.func @transform_10(%arg0: i32) -> (i32, i32) {
    %c0_i32 = arith.constant 0 : i32
    %c0_i32_0 = arith.constant 0 : i32
    %c0_i32_1 = arith.constant 0 : i32
    return %c0_i32, %c0_i32_0 : i32, i32
  }
  func.func @transform_11(%arg0: i32) -> (i32, i32) {
    %c0_i32 = arith.constant 0 : i32
    %c0_i32_0 = arith.constant 0 : i32
    return %arg0, %c0_i32 : i32, i32
  }
}

</mosaic_0001>

<bundles_post_ra>
// kernel: tpu_custom_call.1
= control target key start
LH: loop header
LB: loop body
LE: loop exit
PB: predicated region body
PF: predicated region fallthrough
CT: control target
= control target key end

     0   :  { %16 = vsyncpa [#allocation3], 0  ;;  %s905_s0 = inlined_call_operand.hbm [shape: f32[8,32], index: 0, kind: input, shape index: {}]   ;;  %s906_s1 = inlined_call_operand.hbm [shape: f32[32,128], index: 1, kind: input, shape index: {}]   ;;  %s907_s2 = inlined_call_operand.hbm [shape: f32[1,128], index: 2, kind: input, shape index: {}]   ;;  %s908_s3 = inlined_call_operand.hbm [shape: f32[128,256], index: 3, kind: input, shape index: {}]   ;;  %s909_s4 = inlined_call_operand.vmem [shape: f32[1,256], index: 4, kind: input, shape index: {}]   ;;  %s910_s5 = inlined_call_operand.hbm [shape: f32[256,256], index: 5, kind: input, shape index: {}]   ;;  %s911_s6 = inlined_call_operand.vmem [shape: f32[1,256], index: 6, kind: input, shape index: {}]   ;;  %s912_s7 = inlined_call_operand.hbm [shape: f32[256,128], index: 7, kind: input, shape index: {}]   ;;  %s913_s8 = inlined_call_operand.vmem [shape: f32[1,128], index: 8, kind: input, shape index: {}]   ;;  %s914_s9 = inlined_call_operand.hbm [shape: f32[128,128], index: 9, kind: input, shape index: {}]   ;;  %s915_s10 = inlined_call_operand.vmem [shape: f32[1,128], index: 10, kind: input, shape index: {}]   ;;  %s916_s11 = inlined_call_operand.hbm [shape: f32[8,128], index: 11, kind: output, shape index: {}]  }
   0x1   :  { %17 = vsyncpa [#allocation6], 0 }
   0x2   :  { %18 = vsyncpa [#allocation9], 0 }
   0x3   :  { %19 = vsyncpa [#allocation12], 0  ;;  %s36_s19 = sshll.u32 %s906_s1, 4  ;;  %s37_s19 = int_to_ptr.hbm [resolvable:$true] %s36_s19 }
   0x4   :  { %20 = vsyncpa [#allocation4], 0  ;;  %s780_s20 = smov [#allocation5]   ;;  %s60_s24 = sshll.u32 %s908_s3, 4  ;;  %s61_s24 = int_to_ptr.hbm [resolvable:$true] %s60_s24 }
   0x5   :  { %s38_s21 = sshll.u32 %s780_s20, 4  ;;  %s781_s25 = smov 128   ;;  %s39_s21 = int_to_ptr.vmem [resolvable:$true] %s38_s21 }
   0x6   :  { %s782_s26 = smov 8   ;;  %s783_s27 = smov [#allocation8]  }
   0x7   :  { %44 = dma.hbm_to_vmem [thread:$0]  %s37_s19, 512, %s39_s21, [#allocation6], %s781_s25, %s781_s25, %s782_s26  }
   0x8   :  { %s62_s28 = sshll.u32 %s783_s27, 4  ;;  %s784_s1 = smov 256   ;;  %s63_s28 = int_to_ptr.vmem [resolvable:$true] %s62_s28 }
   0x9   :  { %s785_s29 = smov 16   ;;  %s90_s3 = sshll.u32 %s912_s7, 4  ;;  %s91_s3 = int_to_ptr.hbm [resolvable:$true] %s90_s3 }
   0xa   :  { %68 = dma.hbm_to_vmem [thread:$0]  %s61_s24, 4096, %s63_s28, [#allocation9], %s784_s1, %s784_s1, %s785_s29  }
   0xb   :  { %s786_s13 = smov [#allocation11]   ;;  %s26_s17 = sshll.u32 %s905_s0, 4  ;;  %s27_s17 = int_to_ptr.hbm [resolvable:$true] %s26_s17 }
   0xc   :  { %s92_s14 = sshll.u32 %s786_s13, 4  ;;  %s787_s18 = smov [#allocation2]   ;;  %s93_s14 = int_to_ptr.vmem [resolvable:$true] %s92_s14 }
   0xd   :  { %98 = dma.hbm_to_vmem [thread:$0]  %s91_s3, 4096, %s93_s14, [#allocation12], %s781_s25, %s781_s25, %s782_s26  }
   0xe   :  { %s28_s19 = sshll.u32 %s787_s18, 4  ;;  %s50_s22 = sshll.u32 %s907_s2, 4  ;;  %s29_s19 = int_to_ptr.vmem [resolvable:$true] %s28_s19  ;;  %s51_s22 = int_to_ptr.hbm [resolvable:$true] %s50_s22 }
   0xf   :  { %31 = dma.hbm_to_vmem [thread:$0]  %s27_s17, 128, %s29_s19, [#allocation3]  }
  0x10   :  { %s75_s24 = sshll.u32 %s910_s5, 4  ;;  %s788_s27 = smov [#allocation7]   ;;  %s76_s24 = int_to_ptr.hbm [resolvable:$true] %s75_s24 }
  0x11   :  { %s52_s0 = sshll.u32 %s788_s27, 4  ;;  %s789_s28 = smov [#allocation10]   ;;  %s53_s0 = int_to_ptr.vmem [resolvable:$true] %s52_s0 }
  0x12   :  { %55 = dma.hbm_to_vmem [thread:$0]  %s51_s22, 16, %s53_s0, [#allocation6]  }
  0x13   :  { %s77_s30 = sshll.u32 %s789_s28, 4  ;;  %s105_s13 = sshll.u32 %s914_s9, 4  ;;  %s78_s30 = int_to_ptr.vmem [resolvable:$true] %s77_s30  ;;  %s106_s13 = int_to_ptr.hbm [resolvable:$true] %s105_s13 }
  0x14   :  { %83 = dma.hbm_to_vmem [thread:$0]  %s76_s24, 8192, %s78_s30, [#allocation9], %s784_s1, %s784_s1, %s785_s29  }
  0x15   :  { %s790_s2 = smov [#allocation13]  }
  0x16   :  { %s107_s14 = sshll.u32 %s790_s2, 4  ;;  %s108_s14 = int_to_ptr.vmem [resolvable:$true] %s107_s14 }
  0x17   :  { %113 = dma.hbm_to_vmem [thread:$0]  %s106_s13, 2048, %s108_s14, [#allocation12], %s781_s25, %s781_s25, %s782_s26  }
  0x18   :  { %770 = dma.done.wait [#allocation3], 128  }
  0x19   :  { %771 = vsyncadd [#allocation3], 4294967168 }
  0x1a   :  { %772 = dma.done.wait [#allocation6], 528  }
  0x1b   :  { %773 = vsyncadd [#allocation6], 4294966768 }
  0x1c   :  { %774 = dma.done.wait [#allocation9], 12288  }
  0x1d   :  { %775 = vsyncadd [#allocation9], 4294955008 }
  0x1e   :  { %776 = dma.done.wait [#allocation12], 6144  }
  0x1f   :  { %777 = vsyncadd [#allocation12], 4294961152  ;;  %v148_v0 = vld [vmem:[#allocation5 + $0x18] sm:$0xff]  ;;  %v147_v1 = vld [vmem:[#allocation5 + $0x10] sm:$0xff]  ;;  %vm153_vm0 = vcmask 261120   ;;  %s791_s15 = smov 119  }
  0x20   :  { %169 = vmatpush.msra.mxu0 %v148_v0  ;;  %v146_v2 = vld [vmem:[#allocation5 + $0x8] sm:$0xff]  ;;  %v208_v3 = vld [vmem:[#allocation8 + $0xf0] sm:$0xff]  ;;  %v209_v4 = vld [vmem:[#allocation8 + $0xf8] sm:$0xff]  ;;  %s546_s19 = sshll.u32 %s916_s11, 4  ;;  %s547_s19 = int_to_ptr.hbm [resolvable:$true] %s546_s19 }
  0x21   :  { %216 = vmatpush.msra.mxu1 %v208_v3  ;;  %v206_v5 = vld [vmem:[#allocation8 + $0xe0] sm:$0xff]  ;;  %v207_v6 = vld [vmem:[#allocation8 + $0xe8] sm:$0xff]  ;;  %236 = vmatpush.msra.mxu2 %v209_v4  ;;  %v204_v7 = vld [vmem:[#allocation8 + $0xd0] sm:$0xff] }
  0x22   :  { %170 = vmatpush.msra.mxu0 %v147_v1  ;;  %v145_v8 = vld [vmem:[#allocation5] sm:$0xff]  ;;  %v144_v10 = vld [vmem:[#allocation2] sm:$0xff]  ;;  %v203_v12 = vld [vmem:[#allocation8 + $0xc8] sm:$0xff] }
  0x23   :  { %217 = vmatpush.msra.mxu1 %v206_v5  ;;  %v205_v9 = vld [vmem:[#allocation8 + $0xd8] sm:$0xff]  ;;  %237 = vmatpush.msra.mxu2 %v207_v6  ;;  %v202_v11 = vld [vmem:[#allocation8 + $0xc0] sm:$0xff]  ;;  %v200_v13 = vld [vmem:[#allocation8 + $0xb0] sm:$0xff] }
  0x24   :  { %171 = vmatpush.msra.mxu0 %v146_v2  ;;  %v201_v14 = vld [vmem:[#allocation8 + $0xb8] sm:$0xff]  ;;  %v198_v15 = vld [vmem:[#allocation8 + $0xa0] sm:$0xff]  ;;  %v199_v16 = vld [vmem:[#allocation8 + $0xa8] sm:$0xff] }
  0x25   :  { %218 = vmatpush.msra.mxu1 %v204_v7  ;;  %238 = vmatpush.msra.mxu2 %v205_v9  ;;  %v196_v17 = vld [vmem:[#allocation8 + $0x90] sm:$0xff]  ;;  %v197_v18 = vld [vmem:[#allocation8 + $0x98] sm:$0xff]  ;;  %v194_v19 = vld [vmem:[#allocation8 + $0x80] sm:$0xff] }
  0x26   :  { %172 = vmatpush.msra.mxu0 %v145_v8  ;;  %v195_v20 = vld [vmem:[#allocation8 + $0x88] sm:$0xff]  ;;  %v192_v21 = vld [vmem:[#allocation8 + $0x70] sm:$0xff]  ;;  %v193_v22 = vld [vmem:[#allocation8 + $0x78] sm:$0xff] }
  0x27   :  { %559 = vmatmul.msk.f32.vlgmr.msra.gmra.mxu0 %vm153_vm0, %v144_v10  ;;  %219 = vmatpush.msra.mxu1 %v202_v11  ;;  %v190_v23 = vld [vmem:[#allocation8 + $0x60] sm:$0xff]  ;;  %v191_v24 = vld [vmem:[#allocation8 + $0x68] sm:$0xff]  ;;  %v188_v25 = vld [vmem:[#allocation8 + $0x50] sm:$0xff] }
  0x28   :  { %239 = vmatpush.msra.mxu2 %v203_v12  ;;  %v189_v26 = vld [vmem:[#allocation8 + $0x58] sm:$0xff]  ;;  %v186_v27 = vld [vmem:[#allocation8 + $0x40] sm:$0xff]  ;;  %v187_v28 = vld [vmem:[#allocation8 + $0x48] sm:$0xff] }
  0x29   :  { %220 = vmatpush.msra.mxu1 %v200_v13  ;;  %v184_v29 = vld [vmem:[#allocation8 + $0x30] sm:$0xff]  ;;  %v185_v30 = vld [vmem:[#allocation8 + $0x38] sm:$0xff]  ;;  %v182_v31 = vld [vmem:[#allocation8 + $0x20] sm:$0xff] }
  0x2a   :  { %240 = vmatpush.msra.mxu2 %v201_v14  ;;  %v183_v32 = vld [vmem:[#allocation8 + $0x28] sm:$0xff]  ;;  %v180_v33 = vld [vmem:[#allocation8 + $0x10] sm:$0xff]  ;;  %v181_v34 = vld [vmem:[#allocation8 + $0x18] sm:$0xff] }
  0x2b   :  { %221 = vmatpush.msra.mxu1 %v198_v15  ;;  %v178_v35 = vld [vmem:[#allocation8] sm:$0xff]  ;;  %v179_v36 = vld [vmem:[#allocation8 + $0x8] sm:$0xff]  ;;  %v288_v37 = vld [vmem:[#allocation10 + $0xf0] sm:$0xff] }
  0x2c   :  { %241 = vmatpush.msra.mxu2 %v199_v16  ;;  %v289_v38 = vld [vmem:[#allocation10 + $0xf8] sm:$0xff]  ;;  %v286_v39 = vld [vmem:[#allocation10 + $0xe0] sm:$0xff]  ;;  %328 = vmatpush.msra.mxu3 %v288_v37  ;;  %v287_v40 = vld [vmem:[#allocation10 + $0xe8] sm:$0xff] }
  0x2d   :  { %222 = vmatpush.msra.mxu1 %v196_v17  ;;  %v284_v41 = vld [vmem:[#allocation10 + $0xd0] sm:$0xff]  ;;  %v285_v42 = vld [vmem:[#allocation10 + $0xd8] sm:$0xff]  ;;  %v318_v45 = vld [vmem:[#allocation10 + $0x1e0] sm:$0xff] }
  0x2e   :  { %242 = vmatpush.msra.mxu2 %v197_v18  ;;  %v320_v43 = vld [vmem:[#allocation10 + $0x1f0] sm:$0xff]  ;;  %329 = vmatpush.msra.mxu3 %v286_v39  ;;  %v321_v44 = vld [vmem:[#allocation10 + $0x1f8] sm:$0xff]  ;;  %v282_v46 = vld [vmem:[#allocation10 + $0xc0] sm:$0xff] }
  0x2f   :  { %223 = vmatpush.msra.mxu1 %v194_v19  ;;  %348 = vmatpush.msrb.mxu0 %v320_v43  ;;  %v283_v47 = vld [vmem:[#allocation10 + $0xc8] sm:$0xff]  ;;  %v316_v49 = vld [vmem:[#allocation10 + $0x1d0] sm:$0xff]  ;;  %v317_v50 = vld [vmem:[#allocation10 + $0x1d8] sm:$0xff] }
  0x30   :  { %243 = vmatpush.msra.mxu2 %v195_v20  ;;  %v319_v48 = vld [vmem:[#allocation10 + $0x1e8] sm:$0xff]  ;;  %330 = vmatpush.msra.mxu3 %v284_v41  ;;  %v280_v51 = vld [vmem:[#allocation10 + $0xb0] sm:$0xff]  ;;  %v281_v52 = vld [vmem:[#allocation10 + $0xb8] sm:$0xff] }
  0x31   :  { %224 = vmatpush.msra.mxu1 %v192_v21  ;;  %349 = vmatpush.msrb.mxu0 %v318_v45  ;;  %v314_v53 = vld [vmem:[#allocation10 + $0x1c0] sm:$0xff]  ;;  %v315_v54 = vld [vmem:[#allocation10 + $0x1c8] sm:$0xff]  ;;  %v312_v57 = vld [vmem:[#allocation10 + $0x1b0] sm:$0xff] }
  0x32   :  { %244 = vmatpush.msra.mxu2 %v193_v22  ;;  %331 = vmatpush.msra.mxu3 %v282_v46  ;;  %v278_v55 = vld [vmem:[#allocation10 + $0xa0] sm:$0xff]  ;;  %v279_v56 = vld [vmem:[#allocation10 + $0xa8] sm:$0xff]  ;;  %v313_v58 = vld [vmem:[#allocation10 + $0x1b8] sm:$0xff] }
  0x33   :  { %225 = vmatpush.msra.mxu1 %v190_v23  ;;  %350 = vmatpush.msrb.mxu0 %v316_v49  ;;  %v276_v59 = vld [vmem:[#allocation10 + $0x90] sm:$0xff]  ;;  %v277_v60 = vld [vmem:[#allocation10 + $0x98] sm:$0xff]  ;;  %v310_v61 = vld [vmem:[#allocation10 + $0x1a0] sm:$0xff] }
  0x34   :  { %245 = vmatpush.msra.mxu2 %v191_v24  ;;  %332 = vmatpush.msra.mxu3 %v280_v51  ;;  %v311_v62 = vld [vmem:[#allocation10 + $0x1a8] sm:$0xff]  ;;  %v274_v63 = vld [vmem:[#allocation10 + $0x80] sm:$0xff]  ;;  %v308_v1 = vld [vmem:[#allocation10 + $0x190] sm:$0xff] }
  0x35   :  { %226 = vmatpush.msra.mxu1 %v188_v25  ;;  %351 = vmatpush.msrb.mxu0 %v314_v53  ;;  %v275_v0 = vld [vmem:[#allocation10 + $0x88] sm:$0xff]  ;;  %v309_v2 = vld [vmem:[#allocation10 + $0x198] sm:$0xff]  ;;  %v272_v3 = vld [vmem:[#allocation10 + $0x70] sm:$0xff] }
  0x36   :  { %246 = vmatpush.msra.mxu2 %v189_v26  ;;  %333 = vmatpush.msra.mxu3 %v278_v55  ;;  %v273_v4 = vld [vmem:[#allocation10 + $0x78] sm:$0xff]  ;;  %v306_v5 = vld [vmem:[#allocation10 + $0x180] sm:$0xff]  ;;  %v307_v6 = vld [vmem:[#allocation10 + $0x188] sm:$0xff] }
  0x37   :  { %227 = vmatpush.msra.mxu1 %v186_v27  ;;  %352 = vmatpush.msrb.mxu0 %v312_v57  ;;  %v270_v7 = vld [vmem:[#allocation10 + $0x60] sm:$0xff]  ;;  %v271_v8 = vld [vmem:[#allocation10 + $0x68] sm:$0xff]  ;;  %v304_v9 = vld [vmem:[#allocation10 + $0x170] sm:$0xff] }
  0x38   :  { %247 = vmatpush.msra.mxu2 %v187_v28  ;;  %334 = vmatpush.msra.mxu3 %v276_v59  ;;  %v305_v10 = vld [vmem:[#allocation10 + $0x178] sm:$0xff]  ;;  %v268_v11 = vld [vmem:[#allocation10 + $0x50] sm:$0xff]  ;;  %v302_v13 = vld [vmem:[#allocation10 + $0x160] sm:$0xff] }
  0x39   :  { %228 = vmatpush.msra.mxu1 %v184_v29  ;;  %353 = vmatpush.msrb.mxu0 %v310_v61  ;;  %v269_v12 = vld [vmem:[#allocation10 + $0x58] sm:$0xff]  ;;  %v303_v14 = vld [vmem:[#allocation10 + $0x168] sm:$0xff]  ;;  %v266_v15 = vld [vmem:[#allocation10 + $0x40] sm:$0xff] }
  0x3a   :  { %248 = vmatpush.msra.mxu2 %v185_v30  ;;  %335 = vmatpush.msra.mxu3 %v274_v63  ;;  %v267_v16 = vld [vmem:[#allocation10 + $0x48] sm:$0xff]  ;;  %v264_v17 = vld [vmem:[#allocation10 + $0x30] sm:$0xff]  ;;  %v265_v18 = vld [vmem:[#allocation10 + $0x38] sm:$0xff] }
  0x3b   :  { %229 = vmatpush.msra.mxu1 %v182_v31  ;;  %354 = vmatpush.msrb.mxu0 %v308_v1  ;;  %v575_v19 = vld [vmem:[#allocation7] ss:$0 sm:$0xff]  ;;  %v262_v23 = vld [vmem:[#allocation10 + $0x20] sm:$0xff]  ;;  %v300_v24 = vld [vmem:[#allocation10 + $0x150] sm:$0xff] }
  0x3c   :  { %249 = vmatpush.msra.mxu2 %v183_v32  ;;  %336 = vmatpush.msra.mxu3 %v272_v3  ;;  %v263_v25 = vld [vmem:[#allocation10 + $0x28] sm:$0xff]  ;;  %v301_v26 = vld [vmem:[#allocation10 + $0x158] sm:$0xff]  ;;  %v260_v27 = vld [vmem:[#allocation10 + $0x10] sm:$0xff] }
  0x3d   :  { %230 = vmatpush.msra.mxu1 %v180_v33  ;;  %355 = vmatpush.msrb.mxu0 %v306_v5  ;;  %v298_v28 = vld [vmem:[#allocation10 + $0x140] sm:$0xff]  ;;  %v261_v29 = vld [vmem:[#allocation10 + $0x18] sm:$0xff]  ;;  %v299_v30 = vld [vmem:[#allocation10 + $0x148] sm:$0xff] }
  0x3e   :  { %250 = vmatpush.msra.mxu2 %v181_v34  ;;  %337 = vmatpush.msra.mxu3 %v270_v7  ;;  %v258_v31 = vld [vmem:[#allocation10] sm:$0xff]  ;;  %v296_v32 = vld [vmem:[#allocation10 + $0x130] sm:$0xff]  ;;  %v259_v33 = vld [vmem:[#allocation10 + $0x8] sm:$0xff] }
  0x3f   :  { %231 = vmatpush.msra.mxu1 %v178_v35  ;;  %356 = vmatpush.msrb.mxu0 %v304_v9  ;;  %v297_v34 = vld [vmem:[#allocation10 + $0x138] sm:$0xff]  ;;  %v294_v35 = vld [vmem:[#allocation10 + $0x120] sm:$0xff]  ;;  %v292_v37 = vld [vmem:[#allocation10 + $0x110] sm:$0xff] }
  0x40   :  { %251 = vmatpush.msra.mxu2 %v179_v36  ;;  %338 = vmatpush.msra.mxu3 %v268_v11  ;;  %v295_v36 = vld [vmem:[#allocation10 + $0x128] sm:$0xff]  ;;  %v290_v39 = vld [vmem:[#allocation10 + $0x100] sm:$0xff]  ;;  %v425_v41 = vld [vmem:[#allocation11 + $0x78] sm:$0xff] }
  0x41   :  { %368 = vmatpush.msrb.mxu1 %v289_v38  ;;  %357 = vmatpush.msrb.mxu0 %v302_v13  ;;  %v293_v38 = vld [vmem:[#allocation10 + $0x118] sm:$0xff]  ;;  %v423_v45 = vld [vmem:[#allocation11 + $0x68] sm:$0xff]  ;;  %v420_v51 = vld [vmem:[#allocation11 + $0x50] sm:$0xff] }
  0x42   :  { %388 = vmatpush.msrb.mxu2 %v321_v44  ;;  %339 = vmatpush.msra.mxu3 %v266_v15  ;;  %v441_v43 = vld [vmem:[#allocation11 + $0xf8] sm:$0xff]  ;;  %v440_v44 = vld [vmem:[#allocation11 + $0xf0] sm:$0xff]  ;;  %v439_v46 = vld [vmem:[#allocation11 + $0xe8] sm:$0xff] }
  0x43   :  { %369 = vmatpush.msrb.mxu1 %v287_v40  ;;  %358 = vmatpush.msrb.mxu0 %v300_v24  ;;  %v291_v40 = vld [vmem:[#allocation10 + $0x108] sm:$0xff]  ;;  %v421_v49 = vld [vmem:[#allocation11 + $0x58] sm:$0xff]  ;;  %v418_v55 = vld [vmem:[#allocation11 + $0x40] sm:$0xff] }
  0x44   :  { %389 = vmatpush.msrb.mxu2 %v319_v48  ;;  %340 = vmatpush.msra.mxu3 %v264_v17  ;;  %v438_v48 = vld [vmem:[#allocation11 + $0xe0] sm:$0xff]  ;;  %v419_v53 = vld [vmem:[#allocation11 + $0x48] sm:$0xff]  ;;  %v210_v57 = vld [vmem:[%s909_s4] sm:$0x3] }
  0x45   :  { %370 = vmatpush.msrb.mxu1 %v285_v42  ;;  %359 = vmatpush.msrb.mxu0 %v298_v28  ;;  %v424_v42 = vld [vmem:[#allocation11 + $0x70] sm:$0xff]  ;;  %v434_v3 = vld [vmem:[#allocation11 + $0xc0] sm:$0xff]  ;;  %v433_v5 = vld [vmem:[#allocation11 + $0xb8] sm:$0xff] }
  0x46   :  { %390 = vmatpush.msrb.mxu2 %v317_v50  ;;  %341 = vmatpush.msra.mxu3 %v262_v23  ;;  %v437_v50 = vld [vmem:[#allocation11 + $0xd8] sm:$0xff]  ;;  %v432_v7 = vld [vmem:[#allocation11 + $0xb0] sm:$0xff]  ;;  %v431_v9 = vld [vmem:[#allocation11 + $0xa8] sm:$0xff] }
  0x47   :  { %371 = vmatpush.msrb.mxu1 %v283_v47  ;;  %360 = vmatpush.msrb.mxu0 %v296_v32  ;;  %v422_v47 = vld [vmem:[#allocation11 + $0x60] sm:$0xff]  ;;  %v429_v13 = vld [vmem:[#allocation11 + $0x98] sm:$0xff]  ;;  %v428_v15 = vld [vmem:[#allocation11 + $0x90] sm:$0xff] }
  0x48   :  { %391 = vmatpush.msrb.mxu2 %v315_v54  ;;  %342 = vmatpush.msra.mxu3 %v260_v27  ;;  %v435_v54 = vld [vmem:[#allocation11 + $0xc8] sm:$0xff]  ;;  %v430_v11 = vld [vmem:[#allocation11 + $0xa0] sm:$0xff]  ;;  %v497_v23 = vld [vmem:[#allocation13 + $0x50] sm:$0xff] }
  0x49   :  { %372 = vmatpush.msrb.mxu1 %v281_v52  ;;  %361 = vmatpush.msrb.mxu0 %v294_v35  ;;  %v436_v52 = vld [vmem:[#allocation11 + $0xd0] sm:$0xff]  ;;  %v426_v17 = vld [vmem:[#allocation11 + $0x80] sm:$0xff]  ;;  %v496_v24 = vld [vmem:[#allocation13 + $0x48] sm:$0xff] }
  0x4a   :  { %392 = vmatpush.msrb.mxu2 %v313_v58  ;;  %343 = vmatpush.msra.mxu3 %v258_v31  ;;  %v212_v58 = vperm.slane %v210_v57, 0  ;;  %v493_v27 = vld [vmem:[#allocation13 + $0x30] sm:$0xff] }
  0x4b   :  { %373 = vmatpush.msrb.mxu1 %v279_v56  ;;  %362 = vmatpush.msrb.mxu0 %v292_v37  ;;  %v417_v56 = vld [vmem:[#allocation11 + $0x38] sm:$0xff]  ;;  %v322_v28 = vld [vmem:[%s911_s6] sm:$0x3] }
  0x4c   :  { %393 = vmatpush.msrb.mxu2 %v311_v62  ;;  %446 = vmatpush.msrb.mxu3 %v425_v41  ;;  %v213_v62 = vperm.slane %v210_v57, 1  ;;  %v325_v32 = vperm.slane %v322_v28, 1 }
  0x4d   :  { %374 = vmatpush.msrb.mxu1 %v277_v60  ;;  %363 = vmatpush.msrb.mxu0 %v290_v39 }
  0x4e   :  { %394 = vmatpush.msrb.mxu2 %v309_v2  ;;  %447 = vmatpush.msrb.mxu3 %v424_v42  ;;  %v416_v2 = vld [vmem:[#allocation11 + $0x30] sm:$0xff]  ;;  %v491_v42 = vld [vmem:[#allocation13 + $0x20] sm:$0xff] }
  0x4f   :  { %375 = vmatpush.msrb.mxu1 %v275_v0  ;;  %466 = vmatpush.msra.mxu0 %v441_v43  ;;  %v490_v43 = vld [vmem:[#allocation13 + $0x18] sm:$0xff] }
  0x50   :  { %395 = vmatpush.msrb.mxu2 %v307_v6  ;;  %448 = vmatpush.msrb.mxu3 %v423_v45  ;;  %v414_v6 = vld [vmem:[#allocation11 + $0x20] sm:$0xff]  ;;  %v488_v45 = vld [vmem:[#allocation13 + $0x8] sm:$0xff] }
  0x51   :  { %376 = vmatpush.msrb.mxu1 %v273_v4  ;;  %467 = vmatpush.msra.mxu0 %v440_v44  ;;  %v415_v4 = vld [vmem:[#allocation11 + $0x28] sm:$0xff]  ;;  %v489_v44 = vld [vmem:[#allocation13 + $0x10] sm:$0xff] }
  0x52   :  { %396 = vmatpush.msrb.mxu2 %v305_v10  ;;  %449 = vmatpush.msrb.mxu3 %v422_v47  ;;  %v412_v10 = vld [vmem:[#allocation11 + $0x10] sm:$0xff] }
  0x53   :  { %377 = vmatpush.msrb.mxu1 %v271_v8  ;;  %468 = vmatpush.msra.mxu0 %v439_v46  ;;  %v413_v8 = vld [vmem:[#allocation11 + $0x18] sm:$0xff]  ;;  %v487_v46 = vld [vmem:[#allocation13] sm:$0xff]  ;;  %v576_v47 = vld [vmem:[%s913_s8] ss:$0 sm:$0xff]  ;;  %s793_s8 = smov [#allocation14]  }
  0x54   :  { %397 = vmatpush.msrb.mxu2 %v303_v14  ;;  %450 = vmatpush.msrb.mxu3 %v421_v49  ;;  %v410_v14 = vld [vmem:[#allocation11] sm:$0xff]  ;;  %s544_s16 = sshll.u32 %s793_s8, 4  ;;  %s545_s16 = int_to_ptr.vmem [resolvable:$true] %s544_s16 }
  0x55   :  { %378 = vmatpush.msrb.mxu1 %v269_v12  ;;  %469 = vmatpush.msra.mxu0 %v438_v48  ;;  %v411_v12 = vld [vmem:[#allocation11 + $0x8] sm:$0xff] }
  0x56   :  { %398 = vmatpush.msrb.mxu2 %v301_v26  ;;  %451 = vmatpush.msrb.mxu3 %v420_v51  ;;  %v494_v26 = vld [vmem:[#allocation13 + $0x38] sm:$0xff] }
  0x57   :  { %379 = vmatpush.msrb.mxu1 %v267_v16  ;;  %470 = vmatpush.msra.mxu0 %v437_v50  ;;  %v427_v16 = vld [vmem:[#allocation11 + $0x88] sm:$0xff] }
  0x58   :  { %399 = vmatpush.msrb.mxu2 %v299_v30  ;;  %452 = vmatpush.msrb.mxu3 %v419_v53  ;;  %v492_v30 = vld [vmem:[#allocation13 + $0x28] sm:$0xff]  ;;  %v577_v53 = vld [vmem:[%s915_s10] ss:$0 sm:$0xff] }
  0x59   :  { %380 = vmatpush.msrb.mxu1 %v265_v18  ;;  %471 = vmatpush.msra.mxu0 %v436_v52  ;;  %v502_v18 = vld [vmem:[#allocation13 + $0x78] sm:$0xff] }
  0x5a   :  { %400 = vmatpush.msrb.mxu2 %v297_v34  ;;  %453 = vmatpush.msrb.mxu3 %v418_v55 }
  0x5b   :  { %381 = vmatpush.msrb.mxu1 %v263_v25  ;;  %472 = vmatpush.msra.mxu0 %v435_v54  ;;  %v495_v25 = vld [vmem:[#allocation13 + $0x40] sm:$0xff] }
  0x5c   :  { %401 = vmatpush.msrb.mxu2 %v295_v36  ;;  %454 = vmatpush.msrb.mxu3 %v417_v56  ;;  %v792_v56 = vmov 0  }
  0x5d   :  { %382 = vmatpush.msrb.mxu1 %v261_v29  ;;  %473 = vmatpush.msra.mxu0 %v434_v3  ;;  %v324_v29 = vperm.slane %v322_v28, 0 }
  0x5e   :  { %402 = vmatpush.msrb.mxu2 %v293_v38  ;;  %455 = vmatpush.msrb.mxu3 %v416_v2 }
  0x5f   :  { %383 = vmatpush.msrb.mxu1 %v259_v33  ;;  %474 = vmatpush.msra.mxu0 %v433_v5 }
  0x60   :  { %403 = vmatpush.msrb.mxu2 %v291_v40  ;;  %456 = vmatpush.msrb.mxu3 %v415_v4 }
  0x61   :  { %475 = vmatpush.msra.mxu0 %v432_v7  ;;  %574 = vset.pattern.permute.xlu0 %v792_v56 }
  0x62   :  { %457 = vmatpush.msrb.mxu3 %v414_v6 }
  0x63   :  { %476 = vmatpush.msra.mxu0 %v431_v9 }
  0x64   :  { %458 = vmatpush.msrb.mxu3 %v413_v8 }
  0x65   :  { %477 = vmatpush.msra.mxu0 %v430_v11 }
  0x66   :  { %459 = vmatpush.msrb.mxu3 %v412_v10 }
  0x67   :  { %478 = vmatpush.msra.mxu0 %v429_v13 }
  0x68   :  { %460 = vmatpush.msrb.mxu3 %v411_v12 }
  0x69   :  { %479 = vmatpush.msra.mxu0 %v428_v15 }
  0x6a   :  { %461 = vmatpush.msrb.mxu3 %v410_v14 }
  0x6b   :  { %480 = vmatpush.msra.mxu0 %v427_v16 }
  0x6d   :  { %481 = vmatpush.msra.mxu0 %v426_v17 }
  0xa4   :  { %v174_v20 = vpop.f32.mrf.mxu0 }
  0xa5   :  { %v175_v21 = vadd.f32 %v575_v19, %v174_v20  ;;  %v501_v19 = vld [vmem:[#allocation13 + $0x70] sm:$0xff]  ;;  %v500_v20 = vld [vmem:[#allocation13 + $0x68] sm:$0xff] }
  0xa7   :  { %v177_v22 = vmax.f32 %v175_v21, 0.0  ;;  %v499_v21 = vld [vmem:[#allocation13 + $0x60] sm:$0xff] }
  0xa9   :  { %232 = vmatmul.f32.vlgmr.msra.gmra.mxu1 %v177_v22  ;;  %252 = vmatmul.f32.vlgmr.msra.gmra.mxu2 %v177_v22  ;;  %v498_v22 = vld [vmem:[#allocation13 + $0x58] sm:$0xff] }
  0xaa   :  { %507 = vmatpush.msra.mxu1 %v502_v18 }
  0xac   :  { %508 = vmatpush.msra.mxu1 %v501_v19 }
  0xae   :  { %509 = vmatpush.msra.mxu1 %v500_v20 }
  0xb0   :  { %510 = vmatpush.msra.mxu1 %v499_v21 }
  0xb2   :  { %511 = vmatpush.msra.mxu1 %v498_v22 }
  0xb4   :  { %512 = vmatpush.msra.mxu1 %v497_v23 }
  0xb6   :  { %513 = vmatpush.msra.mxu1 %v496_v24 }
  0xb8   :  { %514 = vmatpush.msra.mxu1 %v495_v25 }
  0xba   :  { %515 = vmatpush.msra.mxu1 %v494_v26 }
  0xbc   :  { %516 = vmatpush.msra.mxu1 %v493_v27 }
  0xbe   :  { %517 = vmatpush.msra.mxu1 %v492_v30 }
  0xc0   :  { %518 = vmatpush.msra.mxu1 %v491_v42 }
  0xc2   :  { %519 = vmatpush.msra.mxu1 %v490_v43 }
  0xc4   :  { %520 = vmatpush.msra.mxu1 %v489_v44 }
  0xc6   :  { %521 = vmatpush.msra.mxu1 %v488_v45 }
  0xc8   :  { %522 = vmatpush.msra.mxu1 %v487_v46 }
 0x126   :  { %v233_v59 = vpop.f32.mrf.mxu1 }
 0x127   :  { %v234_v60 = vadd.f32 %v233_v59, %v212_v58 }
 0x129   :  { %v256_v61 = vmax.f32 %v234_v60, 0.0 }
 0x12b   :  { %344 = vmatmul.f32.vlgmr.msra.gmra.mxu3 %v256_v61  ;;  %384 = vmatmul.f32.vlgmr.msrb.gmra.mxu1 %v256_v61 }
 0x12c   :  { %v253_v63 = vpop.f32.mrf.mxu2 }
 0x12d   :  { %v254_v0 = vadd.f32 %v253_v63, %v213_v62 }
 0x12f   :  { %v257_v1 = vmax.f32 %v254_v0, 0.0 }
 0x131   :  { %364 = vmatmul.f32.vlgmr.msrb.gmra.mxu0 %v257_v1  ;;  %404 = vmatmul.f32.vlgmr.msrb.gmra.mxu2 %v257_v1 }
 0x1a8   :  { %v385_v34 = vpop.f32.mrf.mxu1 }
 0x1a9   :  { %v386_v37 = vadd.f32 %v385_v34, %v325_v32 }
 0x1ae   :  { %v345_v31 = vpop.f32.mrf.mxu3  ;;  %v365_v35 = vpop.f32.mrf.mxu0 }
 0x1af   :  { %v346_v33 = vadd.f32 %v345_v31, %v324_v29 }
 0x1b1   :  { %v366_v36 = vadd.f32 %v365_v35, %v346_v33 }
 0x1b3   :  { %v408_v38 = vmax.f32 %v366_v36, 0.0 }
 0x1b4   :  { %v405_v39 = vpop.f32.mrf.mxu2 }
 0x1b5   :  { %v406_v40 = vadd.f32 %v405_v39, %v386_v37  ;;  %462 = vmatmul.f32.vlgmr.msrb.gmra.mxu3 %v408_v38 }
 0x1b7   :  { %v409_v41 = vmax.f32 %v406_v40, 0.0 }
 0x1b9   :  { %482 = vmatmul.f32.vlgmr.msra.gmra.mxu0 %v409_v41 }
 0x236   :  { %v483_v50 = vpop.f32.mrf.mxu0 }
 0x238   :  { %v463_v48 = vpop.f32.mrf.mxu3 }
 0x239   :  { %v464_v49 = vadd.f32 %v576_v47, %v463_v48 }
 0x23b   :  { %v484_v51 = vadd.f32 %v483_v50, %v464_v49 }
 0x23d   :  { %v486_v52 = vmax.f32 %v484_v51, 0.0 }
 0x23f   :  { %523 = vmatmul.f32.vlgmr.msra.gmra.mxu1 %v486_v52 }
 0x2bc   :  { %v524_v54 = vpop.f32.mrf.mxu1 }
 0x2bd   :  { %v525_v55 = vadd.f32 %v577_v53, %v524_v54 }
 0x2bf   :  { %528 = vrot.lane.b32.xlu0 %v525_v55, %s791_s15 }
 0x331   :  { %v529_v57 = vpop.permute.xlu0 %528 }
 0x332   :  { %v531_v58 = vsub.f32 %v525_v55, %v529_v57 }
 0x334   :  { %534 = vperm.xlu0 %574, %v531_v58  }
 0x3a6   :  { %v535_v59 = vpop.permute.xlu0 %534 }
 0x3a7   :  { %v537_v60 = vadd.f32 %v535_v59, %v525_v55 }
 0x3a9   :  { %538 = vst [vmem:[#allocation14] sm:$0xff] %v537_v60 }
 0x3aa   :  { %549 = dma.vmem_to_hbm [thread:$0]  %s545_s16, 128, %s547_s19, [#allocation4]  }
 0x3ab   :  { %778 = dma.done.wait [#allocation4], 128  }
 0x3ac   :  { %779 = vsyncadd [#allocation4], 4294967168 }
 0x3ad   :  { %554 = vsyncpa [#allocation3], 1 }
 0x3ae   :  { %555 = vsyncpa [#allocation6], 1 }
 0x3af   :  { %556 = vsyncpa [#allocation9], 1 }
 0x3b0   :  { %557 = vsyncpa [#allocation12], 1 }
 0x3b1   :  { %558 = vsyncpa [#allocation4], 1 }

</bundles_post_ra>
